<compile_context>
chip_gen: v7x
topology: tpu7x:2x2x1
jax: 0.10.0
libtpu: 0.0.40
codegen_flags: <defaults>
</compile_context>

<pallas_src>
import functools

import jax
import jax.numpy as jnp
from jax.experimental import pallas as pl
from jax.experimental.pallas import tpu as pltpu


# ---------------------------------------------------------------------------
# Fused Pallas kernel: spatially-tiled global-avg-pool + 3-layer projection head
# ---------------------------------------------------------------------------
def _simclr_kernel(f_ref,          # (Bp, S_tile, C) bf16 trunk feature tile
                   w1_ref,         # (C, H)         bf16, pre-scaled by 1/S
                   w2_ref,         # (H, H)         bf16
                   w3_ref,         # (H, OUT_PAD)   bf16, zero-padded columns
                   bn_ref,         # (4, H)  f32 rows: g1, be1, g2, be2
                   b3_ref,         # (1, OUT_PAD)   f32, zero-padded columns
                   out_ref,        # (Bp, OUT_PAD)  f32
                   acc_ref,        # (Bp, C)        f32 scratch: pooled sum
                   *, n_batch):    # real (unpadded) batch size, static
    s = pl.program_id(0)

    # ---- init pooled-sum accumulator on the first spatial tile -------------
    @pl.when(s == 0)
    def _():
        acc_ref[...] = jnp.zeros_like(acc_ref)

    # ---- accumulate raw spatial sum in f32 (1/S is folded into w1) ---------
    acc_ref[...] += jnp.sum(f_ref[...].astype(jnp.float32), axis=1)

    # ---- last spatial tile: run the projection head -------------------------
    @pl.when(s == pl.num_programs(0) - 1)
    def _():
        eps = jnp.float32(1e-5)
        inv_b = jnp.float32(1.0 / n_batch)
        b_pad = acc_ref.shape[0]

        bn = bn_ref[...]
        g1, be1 = bn[0:1, :], bn[1:2, :]
        g2, be2 = bn[2:3, :], bn[3:4, :]

        # Zero-out padded batch rows after the nonlinearity so they never
        # pollute the next layer's batch statistics (no-op when Bp == B).
        if b_pad != n_batch:
            row = jax.lax.broadcasted_iota(jnp.int32, (b_pad, 1), 0)
            row_mask = row < n_batch

            def mask_rows(x):
                return jnp.where(row_mask, x, 0.0)
        else:
            def mask_rows(x):
                return x

        feats = acc_ref[...].astype(jnp.bfloat16)            # (Bp, C)

        # layer 1: Linear (bias dropped; cancels under train-mode BN) -> BN -> ReLU
        h = jnp.dot(feats, w1_ref[...], preferred_element_type=jnp.float32)
        mu = jnp.sum(h, axis=0, keepdims=True) * inv_b
        ms = jnp.sum(h * h, axis=0, keepdims=True) * inv_b
        var = ms - mu * mu                                    # biased batch var
        h = (h - mu) * jax.lax.rsqrt(var + eps) * g1 + be1
        h = mask_rows(jnp.maximum(h, 0.0))

        # layer 2: Linear (bias dropped) -> BN -> ReLU
        h = jnp.dot(h.astype(jnp.bfloat16), w2_ref[...],
                    preferred_element_type=jnp.float32)
        mu = jnp.sum(h, axis=0, keepdims=True) * inv_b
        ms = jnp.sum(h * h, axis=0, keepdims=True) * inv_b
        var = ms - mu * mu
        h = (h - mu) * jax.lax.rsqrt(var + eps) * g2 + be2
        h = mask_rows(jnp.maximum(h, 0.0))

        # layer 3: Linear (lane-padded output)
        out = jnp.dot(h.astype(jnp.bfloat16), w3_ref[...],
                      preferred_element_type=jnp.float32)
        out_ref[...] = (out + b3_ref[...]).astype(out_ref.dtype)


# ---------------------------------------------------------------------------
# Spatial-tile selection: largest divisor of S that is a multiple of 8 and
# whose double-buffered bf16 feature tile fits a modest VMEM budget.
# ---------------------------------------------------------------------------
def _pick_spatial_tile(s, b_pad, c, vmem_budget_bytes=8 << 20):
    if s % 8 != 0:
        return s                       # single full-extent block (always legal)
    bytes_per_row = 2 * 2 * b_pad * c  # bf16, double-buffered
    max_tile = max(8, vmem_budget_bytes // max(bytes_per_row, 1))
    best = 8
    for t in range(8, s + 1, 8):
        if s % t == 0 and t <= max_tile:
            best = t
    return best


# ---------------------------------------------------------------------------
# Wrapper
# ---------------------------------------------------------------------------
def simclr_v2_forward(trunk_features, params, *, s_tile=None):
    """trunk_features: (B, S, C) float32 trunk feature map (space flattened)."""
    B, S, C = trunk_features.shape
    H = params["w1"].shape[1]
    OUT = params["w3"].shape[1]
    OUT_PAD = ((OUT + 127) // 128) * 128
    B_PAD = ((B + 7) // 8) * 8

    if s_tile is None:
        s_tile = _pick_spatial_tile(S, B_PAD, C)
    assert S % s_tile == 0, "spatial tile must divide the spatial extent"

    # --- host-side parameter prep (cheap, shape-only) ------------------------
    # fold 1/S of the global average pool into w1; drop b1/b2 (exact under
    # training-mode BN); pad w3/b3 out to a 128-lane multiple.
    w1 = (params["w1"] * (1.0 / S)).astype(jnp.bfloat16)
    w2 = params["w2"].astype(jnp.bfloat16)
    w3 = jnp.zeros((H, OUT_PAD), jnp.bfloat16).at[:, :OUT].set(
        params["w3"].astype(jnp.bfloat16))
    b3 = jnp.zeros((1, OUT_PAD), jnp.float32).at[:, :OUT].set(params["b3"])
    bn = jnp.concatenate(
        [params["g1"], params["be1"], params["g2"], params["be2"]], axis=0)  # (4, H)

    f = trunk_features.astype(jnp.bfloat16)
    if B_PAD != B:
        f = jnp.pad(f, ((0, B_PAD - B), (0, 0), (0, 0)))   # zero rows; see kernel

    grid = (S // s_tile,)

    flops = 2 * B_PAD * S * C + 2 * B_PAD * (C * H + H * H + H * OUT_PAD)
    bytes_accessed = (f.size * 2 + w1.size * 2 + w2.size * 2 + w3.size * 2
                      + bn.size * 4 + b3.size * 4 + B_PAD * OUT_PAD * 4)

    out = pl.pallas_call(
        functools.partial(_simclr_kernel, n_batch=B),
        out_shape=jax.ShapeDtypeStruct((B_PAD, OUT_PAD), jnp.float32),
        grid_spec=pltpu.PrefetchScalarGridSpec(
            num_scalar_prefetch=0,
            grid=grid,
            in_specs=[
                pl.BlockSpec((B_PAD, s_tile, C), lambda s: (0, s, 0)),  # feature tile
                pl.BlockSpec((C, H), lambda s: (0, 0)),                 # w1 (resident)
                pl.BlockSpec((H, H), lambda s: (0, 0)),                 # w2 (resident)
                pl.BlockSpec((H, OUT_PAD), lambda s: (0, 0)),           # w3 (resident)
                pl.BlockSpec((4, H), lambda s: (0, 0)),                 # packed BN params
                pl.BlockSpec((1, OUT_PAD), lambda s: (0, 0)),           # b3
            ],
            out_specs=pl.BlockSpec((B_PAD, OUT_PAD), lambda s: (0, 0)),
            scratch_shapes=[pltpu.VMEM((B_PAD, C), jnp.float32)],       # pooled sum
        ),
        compiler_params=pltpu.CompilerParams(
            # S is a reduction axis (BN stats need the full batch on one core)
            dimension_semantics=("arbitrary",),
            vmem_limit_bytes=32 * 1024 * 1024,   # safe on v5e/v6e/v7x
        ),
        cost_estimate=pl.CostEstimate(
            flops=flops, transcendentals=0, bytes_accessed=bytes_accessed),
    )(f, w1, w2, w3, bn, b3)

    return out[:B, :OUT]


# ---------------------------------------------------------------------------
# Deterministic parameter init (synthetic; mimics module shapes / PyTorch init)
# ---------------------------------------------------------------------------
def init_params(key, input_dim, hidden_dim, output_dim):
    ks = jax.random.split(key, 3)

    def lin(k, fan_in, fan_out):
        bound = 1.0 / jnp.sqrt(fan_in)
        w = jax.random.uniform(k, (fan_in, fan_out), jnp.float32, -bound, bound)
        b = jax.random.uniform(jax.random.fold_in(k, 1), (1, fan_out),
                               jnp.float32, -bound, bound)
        return w, b

    w1, b1 = lin(ks[0], input_dim, hidden_dim)
    w2, b2 = lin(ks[1], hidden_dim, hidden_dim)
    w3, b3 = lin(ks[2], hidden_dim, output_dim)

    # BatchNorm1d affine params (PyTorch init: weight=1, bias=0)
    g1 = jnp.ones((1, hidden_dim), jnp.float32)
    be1 = jnp.zeros((1, hidden_dim), jnp.float32)
    g2 = jnp.ones((1, hidden_dim), jnp.float32)
    be2 = jnp.zeros((1, hidden_dim), jnp.float32)

    return dict(w1=w1, b1=b1, g1=g1, be1=be1,
                w2=w2, b2=b2, g2=g2, be2=be2,
                w3=w3, b3=b3)


# Pure-f32 JAX reference of the module tail (including b1/b2, which cancel
# exactly under training-mode BatchNorm).
def _reference(trunk_features, p):
    eps = 1e-5
    feats = jnp.mean(trunk_features, axis=1)
    h = feats @ p["w1"] + p["b1"]
    mu, var = jnp.mean(h, 0, keepdims=True), jnp.var(h, 0, keepdims=True)
    h = jnp.maximum((h - mu) / jnp.sqrt(var + eps) * p["g1"] + p["be1"], 0.0)
    h = h @ p["w2"] + p["b2"]
    mu, var = jnp.mean(h, 0, keepdims=True), jnp.var(h, 0, keepdims=True)
    h = jnp.maximum((h - mu) / jnp.sqrt(var + eps) * p["g2"] + p["be2"], 0.0)
    return h @ p["w3"] + p["b3"]


if __name__ == "__main__":
    # Small shapes consistent with the module (scaled down from 1280/512/128):
    #   batch B = 8, trunk channels C = 256, spatial 8x8 -> S = 64,
    #   hidden_dim = 128, output_dim = 64 (padded to 128 lanes in-kernel).
    B, Hs, Ws, C = 8, 8, 8, 256
    HIDDEN, OUT = 128, 64
    S = Hs * Ws

    key = jax.random.PRNGKey(0)
    k_x, k_p = jax.random.split(key)

    # Synthetic trunk output feature map, (B, S, C)  (see layout comment above)
    trunk_features = jax.random.normal(k_x, (B, S, C), jnp.float32)
    params = init_params(k_p, input_dim=C, hidden_dim=HIDDEN, output_dim=OUT)

    out = jax.block_until_ready(simclr_v2_forward(trunk_features, params))
    ref = _reference(trunk_features, params)

    assert out.shape == (B, OUT)
    # bf16 matmul operands vs a pure-f32 reference -> bf16-appropriate tolerance
    assert jnp.allclose(out, ref, atol=5e-2, rtol=5e-2), (
        "mismatch vs JAX reference, max abs diff = "
        f"{float(jnp.max(jnp.abs(out - ref)))}")

    print("KERNEL_OK")
</pallas_src>

<mosaic_0001>
module attributes {stable_mosaic.version = 11 : i64} {
  func.func @_simclr_kernel(%arg0: i32, %arg1: memref<8x64x256xbf16, #tpu.memory_space<vmem>>, %arg2: memref<256x128xbf16, #tpu.memory_space<vmem>>, %arg3: memref<128x128xbf16, #tpu.memory_space<vmem>>, %arg4: memref<128x128xbf16, #tpu.memory_space<vmem>>, %arg5: memref<4x128xf32, #tpu.memory_space<vmem>>, %arg6: memref<1x128xf32, #tpu.memory_space<vmem>>, %arg7: memref<8x128xf32, #tpu.memory_space<vmem>>, %arg8: memref<8x256xf32, #tpu.memory_space<vmem>>) attributes {dimension_semantics = [#tpu.dimension_semantics<arbitrary>], iteration_bounds = array<i64: 1>, scalar_prefetch = 0 : i64, scratch_operands = 1 : i64, tpu.core_type = #tpu.core_type<tc>, window_params = [{transform_indices = @transform_0, window_bounds = array<i64: 8, 64, 256>}, {pipeline_mode = #tpu.pipeline_mode<synchronous>, transform_indices = @transform_1, window_bounds = array<i64: 256, 128>}, {pipeline_mode = #tpu.pipeline_mode<synchronous>, transform_indices = @transform_2, window_bounds = array<i64: 128, 128>}, {pipeline_mode = #tpu.pipeline_mode<synchronous>, transform_indices = @transform_3, window_bounds = array<i64: 128, 128>}, {pipeline_mode = #tpu.pipeline_mode<synchronous>, transform_indices = @transform_4, window_bounds = array<i64: 4, 128>}, {pipeline_mode = #tpu.pipeline_mode<synchronous>, transform_indices = @transform_5, window_bounds = array<i64: 1, 128>}, {pipeline_mode = #tpu.pipeline_mode<synchronous>, transform_indices = @transform_6, window_bounds = array<i64: 8, 128>}]} {
    %c0_i32 = arith.constant 0 : i32
    %0 = arith.cmpi eq, %arg0, %c0_i32 : i32
    %1 = arith.extui %0 : i1 to i32
    %c0_i32_0 = arith.constant 0 : i32
    %2 = arith.cmpi ne, %1, %c0_i32_0 : i32
    scf.if %2 {
      %cst_9 = arith.constant 0.000000e+00 : f32
      %12 = vector.broadcast %cst_9 : f32 to vector<8x256xf32>
      %c0_10 = arith.constant 0 : index
      %c0_11 = arith.constant 0 : index
      %13 = vector.load %arg8[%c0_10, %c0_11] : memref<8x256xf32, #tpu.memory_space<vmem>>, vector<8x256xf32>
      tpu.vector_store %arg8[%c0_10, %c0_11], %12 {strides = array<i32>} : memref<8x256xf32, #tpu.memory_space<vmem>>, vector<8x256xf32>,
    } else {
    }
    %c0 = arith.constant 0 : index
    %c0_1 = arith.constant 0 : index
    %3 = vector.load %arg8[%c0, %c0_1] : memref<8x256xf32, #tpu.memory_space<vmem>>, vector<8x256xf32>
    %c0_2 = arith.constant 0 : index
    %c0_3 = arith.constant 0 : index
    %c0_4 = arith.constant 0 : index
    %4 = vector.load %arg1[%c0_2, %c0_3, %c0_4] : memref<8x64x256xbf16, #tpu.memory_space<vmem>>, vector<8x64x256xbf16>
    %5 = arith.extf %4 : vector<8x64x256xbf16> to vector<8x64x256xf32>
    %cst = arith.constant dense<0.000000e+00> : vector<8x256xf32>
    %6 = vector.multi_reduction <add>, %5, %cst [1] : vector<8x64x256xf32> to vector<8x256xf32>
    %7 = arith.addf %3, %6 : vector<8x256xf32>
    %c0_5 = arith.constant 0 : index
    %c0_6 = arith.constant 0 : index
    %8 = vector.load %arg8[%c0_5, %c0_6] : memref<8x256xf32, #tpu.memory_space<vmem>>, vector<8x256xf32>
    tpu.vector_store %arg8[%c0_5, %c0_6], %7 {strides = array<i32>} : memref<8x256xf32, #tpu.memory_space<vmem>>, vector<8x256xf32>,
    %c0_i32_7 = arith.constant 0 : i32
    %9 = arith.cmpi eq, %arg0, %c0_i32_7 : i32
    %10 = arith.extui %9 : i1 to i32
    %c0_i32_8 = arith.constant 0 : i32
    %11 = arith.cmpi ne, %10, %c0_i32_8 : i32
    scf.if %11 {
      %c0_9 = arith.constant 0 : index
      %c0_10 = arith.constant 0 : index
      %12 = vector.load %arg5[%c0_9, %c0_10] : memref<4x128xf32, #tpu.memory_space<vmem>>, vector<4x128xf32>
      %13 = vector.extract_strided_slice %12 {offsets = [0, 0], sizes = [1, 128], strides = [1, 1]} : vector<4x128xf32> to vector<1x128xf32>
      %14 = vector.extract_strided_slice %12 {offsets = [1, 0], sizes = [1, 128], strides = [1, 1]} : vector<4x128xf32> to vector<1x128xf32>
      %15 = vector.extract_strided_slice %12 {offsets = [2, 0], sizes = [1, 128], strides = [1, 1]} : vector<4x128xf32> to vector<1x128xf32>
      %16 = vector.extract_strided_slice %12 {offsets = [3, 0], sizes = [1, 128], strides = [1, 1]} : vector<4x128xf32> to vector<1x128xf32>
      %c0_11 = arith.constant 0 : index
      %c0_12 = arith.constant 0 : index
      %17 = vector.load %arg8[%c0_11, %c0_12] : memref<8x256xf32, #tpu.memory_space<vmem>>, vector<8x256xf32>
      %18 = arith.truncf %17 : vector<8x256xf32> to vector<8x256xbf16>
      %c0_13 = arith.constant 0 : index
      %c0_14 = arith.constant 0 : index
      %19 = vector.load %arg2[%c0_13, %c0_14] : memref<256x128xbf16, #tpu.memory_space<vmem>>, vector<256x128xbf16>
      %cst_15 = arith.constant dense<0.000000e+00> : vector<8x128xf32>
      %20 = tpu.matmul %18, %19, %cst_15 {dimension_numbers = #tpu.dot_dimension_numbers<[1], [0], [0], [1], [0, 0, 1, 1], [], []>} : vector<8x256xbf16>, vector<256x128xbf16>, vector<8x128xf32> -> vector<8x128xf32>
      %cst_16 = arith.constant dense<0.000000e+00> : vector<128xf32>
      %21 = vector.multi_reduction <add>, %20, %cst_16 [0] : vector<8x128xf32> to vector<128xf32>
      %22 = vector.shape_cast %21 : vector<128xf32> to vector<1x128xf32>
      %cst_17 = arith.constant 1.250000e-01 : f32
      %23 = vector.broadcast %cst_17 : f32 to vector<1x128xf32>
      %24 = arith.mulf %22, %23 : vector<1x128xf32>
      %25 = arith.mulf %20, %20 : vector<8x128xf32>
      %cst_18 = arith.constant dense<0.000000e+00> : vector<128xf32>
      %26 = vector.multi_reduction <add>, %25, %cst_18 [0] : vector<8x128xf32> to vector<128xf32>
      %27 = vector.shape_cast %26 : vector<128xf32> to vector<1x128xf32>
      %cst_19 = arith.constant 1.250000e-01 : f32
      %28 = vector.broadcast %cst_19 : f32 to vector<1x128xf32>
      %29 = arith.mulf %27, %28 : vector<1x128xf32>
      %30 = arith.mulf %24, %24 : vector<1x128xf32>
      %31 = arith.subf %29, %30 : vector<1x128xf32>
      %32 = vector.broadcast %24 : vector<1x128xf32> to vector<8x128xf32>
      %33 = arith.subf %20, %32 : vector<8x128xf32>
      %cst_20 = arith.constant 9.99999974E-6 : f32
      %34 = vector.broadcast %cst_20 : f32 to vector<1x128xf32>
      %35 = arith.addf %31, %34 : vector<1x128xf32>
      %36 = math.rsqrt %35 : vector<1x128xf32>
      %37 = vector.broadcast %36 : vector<1x128xf32> to vector<8x128xf32>
      %38 = arith.mulf %33, %37 : vector<8x128xf32>
      %39 = vector.broadcast %13 : vector<1x128xf32> to vector<8x128xf32>
      %40 = arith.mulf %38, %39 : vector<8x128xf32>
      %41 = vector.broadcast %14 : vector<1x128xf32> to vector<8x128xf32>
      %42 = arith.addf %40, %41 : vector<8x128xf32>
      %cst_21 = arith.constant 0.000000e+00 : f32
      %43 = vector.broadcast %cst_21 : f32 to vector<8x128xf32>
      %44 = arith.maximumf %42, %43 : vector<8x128xf32>
      %45 = arith.truncf %44 : vector<8x128xf32> to vector<8x128xbf16>
      %c0_22 = arith.constant 0 : index
      %c0_23 = arith.constant 0 : index
      %46 = vector.load %arg3[%c0_22, %c0_23] : memref<128x128xbf16, #tpu.memory_space<vmem>>, vector<128x128xbf16>
      %cst_24 = arith.constant dense<0.000000e+00> : vector<8x128xf32>
      %47 = tpu.matmul %45, %46, %cst_24 {dimension_numbers = #tpu.dot_dimension_numbers<[1], [0], [0], [1], [0, 0, 1, 1], [], []>} : vector<8x128xbf16>, vector<128x128xbf16>, vector<8x128xf32> -> vector<8x128xf32>
      %cst_25 = arith.constant dense<0.000000e+00> : vector<128xf32>
      %48 = vector.multi_reduction <add>, %47, %cst_25 [0] : vector<8x128xf32> to vector<128xf32>
      %49 = vector.shape_cast %48 : vector<128xf32> to vector<1x128xf32>
      %cst_26 = arith.constant 1.250000e-01 : f32
      %50 = vector.broadcast %cst_26 : f32 to vector<1x128xf32>
      %51 = arith.mulf %49, %50 : vector<1x128xf32>
      %52 = arith.mulf %47, %47 : vector<8x128xf32>
      %cst_27 = arith.constant dense<0.000000e+00> : vector<128xf32>
      %53 = vector.multi_reduction <add>, %52, %cst_27 [0] : vector<8x128xf32> to vector<128xf32>
      %54 = vector.shape_cast %53 : vector<128xf32> to vector<1x128xf32>
      %cst_28 = arith.constant 1.250000e-01 : f32
      %55 = vector.broadcast %cst_28 : f32 to vector<1x128xf32>
      %56 = arith.mulf %54, %55 : vector<1x128xf32>
      %57 = arith.mulf %51, %51 : vector<1x128xf32>
      %58 = arith.subf %56, %57 : vector<1x128xf32>
      %59 = vector.broadcast %51 : vector<1x128xf32> to vector<8x128xf32>
      %60 = arith.subf %47, %59 : vector<8x128xf32>
      %cst_29 = arith.constant 9.99999974E-6 : f32
      %61 = vector.broadcast %cst_29 : f32 to vector<1x128xf32>
      %62 = arith.addf %58, %61 : vector<1x128xf32>
      %63 = math.rsqrt %62 : vector<1x128xf32>
      %64 = vector.broadcast %63 : vector<1x128xf32> to vector<8x128xf32>
      %65 = arith.mulf %60, %64 : vector<8x128xf32>
      %66 = vector.broadcast %15 : vector<1x128xf32> to vector<8x128xf32>
      %67 = arith.mulf %65, %66 : vector<8x128xf32>
      %68 = vector.broadcast %16 : vector<1x128xf32> to vector<8x128xf32>
      %69 = arith.addf %67, %68 : vector<8x128xf32>
      %cst_30 = arith.constant 0.000000e+00 : f32
      %70 = vector.broadcast %cst_30 : f32 to vector<8x128xf32>
      %71 = arith.maximumf %69, %70 : vector<8x128xf32>
      %72 = arith.truncf %71 : vector<8x128xf32> to vector<8x128xbf16>
      %c0_31 = arith.constant 0 : index
      %c0_32 = arith.constant 0 : index
      %73 = vector.load %arg4[%c0_31, %c0_32] : memref<128x128xbf16, #tpu.memory_space<vmem>>, vector<128x128xbf16>
      %cst_33 = arith.constant dense<0.000000e+00> : vector<8x128xf32>
      %74 = tpu.matmul %72, %73, %cst_33 {dimension_numbers = #tpu.dot_dimension_numbers<[1], [0], [0], [1], [0, 0, 1, 1], [], []>} : vector<8x128xbf16>, vector<128x128xbf16>, vector<8x128xf32> -> vector<8x128xf32>
      %c0_34 = arith.constant 0 : index
      %c0_35 = arith.constant 0 : index
      %75 = vector.load %arg6[%c0_34, %c0_35] : memref<1x128xf32, #tpu.memory_space<vmem>>, vector<1x128xf32>
      %76 = vector.broadcast %75 : vector<1x128xf32> to vector<8x128xf32>
      %77 = arith.addf %74, %76 : vector<8x128xf32>
      %c0_36 = arith.constant 0 : index
      %c0_37 = arith.constant 0 : index
      %78 = vector.load %arg7[%c0_36, %c0_37] : memref<8x128xf32, #tpu.memory_space<vmem>>, vector<8x128xf32>
      tpu.vector_store %arg7[%c0_36, %c0_37], %77 {strides = array<i32>} : memref<8x128xf32, #tpu.memory_space<vmem>>, vector<8x128xf32>,
    } else {
    }
    return
  }
  func.func @transform_0(%arg0: i32) -> (i32, i32, i32) {
    %c0_i32 = arith.constant 0 : i32
    %c0_i32_0 = arith.constant 0 : i32
    %c0_i32_1 = arith.constant 0 : i32
    return %c0_i32, %arg0, %c0_i32_0 : i32, i32, i32
  }
  func.func @transform_1(%arg0: i32) -> (i32, i32) {
    %c0_i32 = arith.constant 0 : i32
    %c0_i32_0 = arith.constant 0 : i32
    %c0_i32_1 = arith.constant 0 : i32
    return %c0_i32, %c0_i32_0 : i32, i32
  }
  func.func @transform_2(%arg0: i32) -> (i32, i32) {
    %c0_i32 = arith.constant 0 : i32
    %c0_i32_0 = arith.constant 0 : i32
    %c0_i32_1 = arith.constant 0 : i32
    return %c0_i32, %c0_i32_0 : i32, i32
  }
  func.func @transform_3(%arg0: i32) -> (i32, i32) {
    %c0_i32 = arith.constant 0 : i32
    %c0_i32_0 = arith.constant 0 : i32
    %c0_i32_1 = arith.constant 0 : i32
    return %c0_i32, %c0_i32_0 : i32, i32
  }
  func.func @transform_4(%arg0: i32) -> (i32, i32) {
    %c0_i32 = arith.constant 0 : i32
    %c0_i32_0 = arith.constant 0 : i32
    %c0_i32_1 = arith.constant 0 : i32
    return %c0_i32, %c0_i32_0 : i32, i32
  }
  func.func @transform_5(%arg0: i32) -> (i32, i32) {
    %c0_i32 = arith.constant 0 : i32
    %c0_i32_0 = arith.constant 0 : i32
    %c0_i32_1 = arith.constant 0 : i32
    return %c0_i32, %c0_i32_0 : i32, i32
  }
  func.func @transform_6(%arg0: i32) -> (i32, i32) {
    %c0_i32 = arith.constant 0 : i32
    %c0_i32_0 = arith.constant 0 : i32
    %c0_i32_1 = arith.constant 0 : i32
    return %c0_i32, %c0_i32_0 : i32, i32
  }
}

</mosaic_0001>

<bundles_post_ra>
// kernel: tpu_custom_call.1
= control target key start
LH: loop header
LB: loop body
LE: loop exit
PB: predicated region body
PF: predicated region fallthrough
CT: control target
= control target key end

     0   :  { %11 = vsyncpa [#allocation4], 0  ;;  %s1938_s0 = inlined_call_operand.hbm [shape: bf16[8,64,256], index: 0, kind: input, shape index: {}]   ;;  %s1939_s1 = inlined_call_operand.hbm [shape: bf16[256,128], index: 1, kind: input, shape index: {}]   ;;  %s1940_s2 = inlined_call_operand.hbm [shape: bf16[128,128], index: 2, kind: input, shape index: {}]   ;;  %s1941_s3 = inlined_call_operand.hbm [shape: bf16[128,128], index: 3, kind: input, shape index: {}]   ;;  %s1942_s4 = inlined_call_operand.vmem [shape: f32[4,128], index: 4, kind: input, shape index: {}]   ;;  %s1943_s5 = inlined_call_operand.vmem [shape: f32[1,128], index: 5, kind: input, shape index: {}]   ;;  %s1944_s6 = inlined_call_operand.hbm [shape: f32[8,128], index: 6, kind: output, shape index: {}]  }
   0x1   :  { %12 = vsyncpa [#allocation7], 0 }
   0x2   :  { %13 = vsyncpa [#allocation10], 0 }
   0x3   :  { %14 = vsyncpa [#allocation5], 0  ;;  %s1284_s21 = smov [#allocation6]   ;;  %s1166_s25 = scalar_lea.hbm %s1939_s1, 2048 }
   0x4   :  { %s32_s22 = sshll.u32 %s1284_s21, 4  ;;  %p1167_p0 = scmp.ne.s32.totalorder %s1939_s1, %s1166_s25  ;;  %s33_s22 = int_to_ptr.vmem [resolvable:$true] %s32_s22 }
   0x5   :  { %p1170_p1 = scmp.lt.u32.totalorder %s1166_s25, %s1939_s1 }
   0x7   :  { %p1172_p2 = pnand %p1170_p1, %p1167_p0 }
   0x9   :  { %1175 = shalt.err (!%p1172_p2)
}
   0xa   :  { %s1176_s30 = scalar_lea.vmem %s33_s22, 2048  ;;  %p1181_p4 = scmp.lt.s32.totalorder %s33_s22, %s33_s22 }
   0xb   :  { %p1177_p3 = scmp.ne.s32.totalorder %s33_s22, %s1176_s30  ;;  %p1182_p5 = scmp.lt.s32.totalorder %s1176_s30, %s1176_s30 }
   0xd   :  { %p1183_p6 = por %p1182_p5, %p1181_p4 }
   0xf   :  { %p1184_p7 = pnand %p1183_p6, %p1177_p3 }
  0x11   :  { %1187 = shalt.err (!%p1184_p7)
}
  0x12   :  { %s1285_s7 = smov 64   ;;  %s1286_s8 = smov 4  }
  0x13   :  { %38 = dma.hbm_to_vmem [thread:$0]  %s1939_s1, 2048, %s33_s22, [#allocation7], %s1285_s7, %s1285_s7, %s1286_s8  }
  0x14   :  { %s1287_s11 = smov [#allocation3]   ;;  %s1188_s15 = scalar_lea.hbm %s1938_s0, 8192 }
  0x15   :  { %s20_s12 = sshll.u32 %s1287_s11, 4  ;;  %p1189_p8 = scmp.ne.s32.totalorder %s1938_s0, %s1188_s15  ;;  %s21_s12 = int_to_ptr.vmem [resolvable:$true] %s20_s12 }
  0x16   :  { %p1192_p9 = scmp.lt.u32.totalorder %s1188_s15, %s1938_s0 }
  0x18   :  { %p1194_p10 = pnand %p1192_p9, %p1189_p8 }
  0x1a   :  { %1197 = shalt.err (!%p1194_p10)
}
  0x1b   :  { %s1198_s20 = scalar_lea.vmem %s21_s12, 8192  ;;  %p1203_p12 = scmp.lt.s32.totalorder %s21_s12, %s21_s12 }
  0x1c   :  { %p1199_p11 = scmp.ne.s32.totalorder %s21_s12, %s1198_s20  ;;  %p1204_p13 = scmp.lt.s32.totalorder %s1198_s20, %s1198_s20 }
  0x1e   :  { %p1205_p0 = por %p1204_p13, %p1203_p12 }
  0x20   :  { %p1206_p1 = pnand %p1205_p0, %p1199_p11 }
  0x22   :  { %1209 = shalt.err (!%p1206_p1)
}
  0x23   :  { %s1288_s1 = smov 128   ;;  %s1289_s21 = smov 8  }
  0x24   :  { %26 = dma.hbm_to_vmem [thread:$0]  %s1938_s0, 8192, %s21_s12, [#allocation4], %s1288_s1, %s1288_s1, %s1289_s21  }
  0x25   :  { %s1290_s24 = smov [#allocation8]   ;;  %s1291_s26 = smov [#allocation9]  }
  0x26   :  { %s44_s25 = sshll.u32 %s1290_s24, 4  ;;  %s56_s27 = sshll.u32 %s1291_s26, 4  ;;  %s45_s25 = int_to_ptr.vmem [resolvable:$true] %s44_s25  ;;  %s1357_s27 = int_to_ptr.vmem [resolvable:$true] %s56_s27 }
  0x27   :  { %s1210_s30 = scalar_lea.hbm %s1940_s2, 1024 }
  0x28   :  { %p1211_p2 = scmp.ne.s32.totalorder %s1940_s2, %s1210_s30  ;;  %p1214_p3 = scmp.lt.u32.totalorder %s1210_s30, %s1940_s2 }
  0x2a   :  { %p1216_p4 = pnand %p1214_p3, %p1211_p2 }
  0x2c   :  { %1219 = shalt.err (!%p1216_p4)
}
  0x2d   :  { %s1220_s0 = scalar_lea.vmem %s45_s25, 1024  ;;  %p1225_p6 = scmp.lt.s32.totalorder %s45_s25, %s45_s25 }
  0x2e   :  { %p1221_p5 = scmp.ne.s32.totalorder %s45_s25, %s1220_s0  ;;  %p1226_p7 = scmp.lt.s32.totalorder %s1220_s0, %s1220_s0 }
  0x30   :  { %p1227_p8 = por %p1226_p7, %p1225_p6 }
  0x32   :  { %p1228_p9 = pnand %p1227_p8, %p1221_p5 }
  0x34   :  { %1231 = shalt.err (!%p1228_p9)
}
  0x35   :  { %50 = dma.hbm_to_vmem [thread:$0]  %s1940_s2, 1024, %s45_s25, [#allocation7], %s1285_s7, %s1285_s7, %s1286_s8  }
  0x36   :  { %s1232_s17 = scalar_lea.hbm %s1941_s3, 1024 }
  0x37   :  { %p1233_p10 = scmp.ne.s32.totalorder %s1941_s3, %s1232_s17  ;;  %p1236_p11 = scmp.lt.u32.totalorder %s1232_s17, %s1941_s3 }
  0x39   :  { %p1238_p12 = pnand %p1236_p11, %p1233_p10 }
  0x3b   :  { %1241 = shalt.err (!%p1238_p12)
}
  0x3c   :  { %s1242_s21 = scalar_lea.vmem %s1357_s27, 1024  ;;  %p1247_p0 = scmp.lt.s32.totalorder %s1357_s27, %s1357_s27 }
  0x3d   :  { %p1243_p13 = scmp.ne.s32.totalorder %s1357_s27, %s1242_s21  ;;  %p1248_p1 = scmp.lt.s32.totalorder %s1242_s21, %s1242_s21 }
  0x3f   :  { %p1249_p2 = por %p1248_p1, %p1247_p0 }
  0x41   :  { %p1250_p3 = pnand %p1249_p2, %p1243_p13 }
  0x43   :  { %1253 = shalt.err (!%p1250_p3)
}
  0x44   :  { %62 = dma.hbm_to_vmem [thread:$0]  %s1941_s3, 1024, %s1357_s27, [#allocation10], %s1285_s7, %s1285_s7, %s1286_s8  }
  0x45   :  { %1276 = dma.done.wait [#allocation4], 8192  }
  0x46   :  { %1277 = vsyncadd [#allocation4], 4294959104 }
  0x47   :  { %1278 = dma.done.wait [#allocation7], 3072  }
  0x48   :  { %1279 = vsyncadd [#allocation7], 4294964224 }
  0x49   :  { %1280 = dma.done.wait [#allocation10], 1024  }
  0x4a   :  { %1281 = vsyncadd [#allocation10], 4294966272  ;;  %v1130_v0 = vld [vmem:[#allocation6 + $0x40] sm:$0xff]   ;;  %v1132_v2 = vld [vmem:[#allocation6 + $0x48] sm:$0xff]   ;;  %vm504_vm0 = vcmask 1041409   ;;  %vm506_vm1 = vcmask 1042434  }
  0x4b   :  { %v1131_v1 = vld [vmem:[#allocation6] sm:$0xff]   ;;  %1039 = vmatprep.subr.bf16.mxu0 %v1130_v0  ;;  %v1133_v3 = vld [vmem:[#allocation6 + $0x8] sm:$0xff]   ;;  %v1134_v4 = vld [vmem:[#allocation6 + $0x50] sm:$0xff]   ;;  %vm508_vm2 = vcmask 1043459   ;;  %vm510_vm3 = vcmask 1044484   ;;  %vm512_vm4 = vcmask 1045509  }
  0x4c   :  { %1040 = vmatpush3.bf16.msra.mxu0 %v1131_v1  ;;  %v1135_v5 = vld [vmem:[#allocation6 + $0x10] sm:$0xff]   ;;  %v1136_v6 = vld [vmem:[#allocation6 + $0x58] sm:$0xff]   ;;  %v1138_v8 = vld [vmem:[#allocation6 + $0x60] sm:$0xff]   ;;  %vm514_vm5 = vcmask 1046534   ;;  %vm516_vm6 = vcmask 1047559   ;;  %vm1293_vm7 = vmmov 0  }
  0x4d   :  { %1041 = vmatprep.subr.bf16.mxu0 %v1132_v2  ;;  %v1137_v7 = vld [vmem:[#allocation6 + $0x18] sm:$0xff]   ;;  %v1139_v9 = vld [vmem:[#allocation6 + $0x20] sm:$0xff]   ;;  %v1140_v10 = vld [vmem:[#allocation6 + $0x68] sm:$0xff]   ;;  %s1294_s23 = smov [#allocation11]  }
  0x4e   :  { %v1394_v11 = vld [vmem:[#allocation3] sm:$0xff]  ;;  %v1396_v12 = vld [vmem:[#allocation3 + $0x8] sm:$0xff]  ;;  %v1398_v13 = vld [vmem:[#allocation3 + $0x10] sm:$0xff]  ;;  %s995_s24 = sshll.u32 %s1294_s23, 4  ;;  %s996_s24 = int_to_ptr.vmem [resolvable:$true] %s995_s24 }
  0x4f   :  { %1992 = vst [vmem:[#allocation16_spill] sm:$0xff] %v1394_v11  ;;  %1993 = vst [vmem:[#allocation17_spill] sm:$0xff] %v1396_v12  ;;  %v1141_v14 = vld [vmem:[#allocation6 + $0x28] sm:$0xff]   ;;  %v1400_v15 = vld [vmem:[#allocation3 + $0x18] sm:$0xff]  ;;  %v2027_v41 = vunpack.c.h.bf16 %v1394_v11  ;;  %s1254_s25 = scalar_lea.vmem %s996_s24, 128  ;;  %p1259_p5 = scmp.lt.s32.totalorder %s996_s24, %s996_s24 }
  0x50   :  { %1042 = vmatpush3.bf16.msra.mxu0 %v1133_v3  ;;  %v1402_v16 = vld [vmem:[#allocation3 + $0x20] sm:$0xff]  ;;  %v1404_v17 = vld [vmem:[#allocation3 + $0x28] sm:$0xff]  ;;  %v1410_v22 = vld [vmem:[#allocation3 + $0x30] sm:$0xff]  ;;  %p1255_p4 = scmp.ne.s32.totalorder %s996_s24, %s1254_s25  ;;  %p1260_p6 = scmp.lt.s32.totalorder %s1254_s25, %s1254_s25 }
  0x51   :  { %1043 = vmatprep.subr.bf16.mxu0 %v1134_v4  ;;  %v1412_v23 = vld [vmem:[#allocation3 + $0x38] sm:$0xff]  ;;  %v1414_v24 = vld [vmem:[#allocation3 + $0x40] sm:$0xff]  ;;  %v1420_v29 = vld [vmem:[#allocation3 + $0x48] sm:$0xff] }
  0x52   :  { %1994 = vst [vmem:[#allocation18_spill] sm:$0xff] %v1412_v23  ;;  %1995 = vst [vmem:[#allocation19_spill] sm:$0xff] %v1414_v24  ;;  %v1422_v30 = vld [vmem:[#allocation3 + $0x50] sm:$0xff]  ;;  %v1424_v31 = vld [vmem:[#allocation3 + $0x58] sm:$0xff]  ;;  %v2029_v46 = vunpack.c.h.bf16 %v1414_v24  ;;  %p1261_p7 = por %p1260_p6, %p1259_p5 }
  0x53   :  { %1996 = vst [vmem:[#allocation20_spill] sm:$0xff] %v1420_v29  ;;  %v1142_v36 = vld [vmem:[#allocation6 + $0x70] sm:$0xff]   ;;  %v1430_v37 = vld [vmem:[#allocation3 + $0x60] sm:$0xff]  ;;  %v1432_v38 = vld [vmem:[#allocation3 + $0x68] sm:$0xff] }
  0x54   :  { %1044 = vmatpush3.bf16.msra.mxu0 %v1135_v5  ;;  %v1438_v43 = vld [vmem:[#allocation3 + $0x70] sm:$0xff]  ;;  %v1440_v44 = vld [vmem:[#allocation3 + $0x78] sm:$0xff]  ;;  %v1446_v49 = vld [vmem:[#allocation3 + $0x80] sm:$0xff]  ;;  %p1262_p8 = pnand %p1261_p7, %p1255_p4 }
  0x55   :  { %1045 = vmatprep.subr.bf16.mxu0 %v1136_v6  ;;  %1997 = vst [vmem:[#allocation21_spill] sm:$0xff] %v1440_v44  ;;  %1998 = vst [vmem:[#allocation22_spill] sm:$0xff] %v1446_v49  ;;  %v1448_v50 = vld [vmem:[#allocation3 + $0x88] sm:$0xff]  ;;  %v1143_v55 = vld [vmem:[#allocation6 + $0x30] sm:$0xff]  }
  0x56   :  { %v1454_v56 = vld [vmem:[#allocation3 + $0x90] sm:$0xff]  ;;  %v1456_v57 = vld [vmem:[#allocation3 + $0x98] sm:$0xff]  ;;  %v1462_v63 = vld [vmem:[#allocation3 + $0xa0] sm:$0xff]  ;;  %v2032_v53 = vunpack.c.h.bf16 %v1448_v50 }
  0x57   :  { %v1144_v62 = vld [vmem:[#allocation6 + $0x78] sm:$0xff]   ;;  %v1464_v0 = vld [vmem:[#allocation3 + $0xa8] sm:$0xff]  ;;  %v1470_v5 = vld [vmem:[#allocation3 + $0xb0] sm:$0xff] }
  0x58   :  { %1046 = vmatpush3.bf16.msra.mxu0 %v1137_v7  ;;  %1999 = vst [vmem:[#allocation23_spill] sm:$0xff] %v1470_v5  ;;  %v1472_v6 = vld [vmem:[#allocation3 + $0xb8] sm:$0xff]  ;;  %v1486_v34 = vld [vmem:[#allocation3 + $0xd0] sm:$0xff]  ;;  %v1494_v51 = vld [vmem:[#allocation3 + $0xe0] sm:$0xff] }
  0x59   :  { %1047 = vmatprep.subr.bf16.mxu0 %v1138_v8  ;;  %2000 = vst [vmem:[#allocation24_spill] sm:$0xff] %v1472_v6  ;;  %v1145_v60 = vld [vmem:[#allocation6 + $0x38] sm:$0xff]   ;;  %v1496_v1 = vld [vmem:[#allocation3 + $0xe8] sm:$0xff]  ;;  %v1502_v32 = vld [vmem:[#allocation3 + $0xf0] sm:$0xff] }
  0x5a   :  { %v1488_v58 = vld [vmem:[#allocation3 + $0xd8] sm:$0xff]  ;;  %2003 = vst [vmem:[#allocation27_spill] sm:$0xff] %v1502_v32  ;;  %v1510_v18 = vld [vmem:[#allocation3 + $0x100] sm:$0xff]  ;;  %v1518_v27 = vld [vmem:[#allocation3 + $0x110] sm:$0xff] }
  0x5b   :  { %v1504_v47 = vld [vmem:[#allocation3 + $0xf8] sm:$0xff]  ;;  %v1528_v61 = vld [vmem:[#allocation3 + $0x128] sm:$0xff]  ;;  %v1534_v59 = vld [vmem:[#allocation3 + $0x130] sm:$0xff]  ;;  %v2035_v11 = vunpack.c.h.bf16 %v1510_v18 }
  0x5c   :  { %1048 = vmatpush3.bf16.msra.mxu0 %v1139_v9  ;;  %2004 = vst [vmem:[#allocation28_spill] sm:$0xff] %v1504_v47  ;;  %v1520_v25 = vld [vmem:[#allocation3 + $0x118] sm:$0xff]  ;;  %v1526_v9 = vld [vmem:[#allocation3 + $0x120] sm:$0xff]  ;;  %2006 = vst [vmem:[#allocation30_spill] sm:$0xff] %v1534_v59 }
  0x5d   :  { %1049 = vmatprep.subr.bf16.mxu0 %v1140_v10  ;;  %v1536_v45 = vld [vmem:[#allocation3 + $0x138] sm:$0xff]  ;;  %v1538_v2 = vld [vmem:[#allocation3 + $0x140] sm:$0xff]  ;;  %v1544_v42 = vld [vmem:[#allocation3 + $0x148] sm:$0xff] }
  0x5e   :  { %2007 = vst [vmem:[#allocation31_spill] sm:$0xff] %v1536_v45  ;;  %2008 = vst [vmem:[#allocation32_spill] sm:$0xff] %v1544_v42  ;;  %v1548_v35 = vld [vmem:[#allocation3 + $0x158] sm:$0xff]  ;;  %v1554_v28 = vld [vmem:[#allocation3 + $0x160] sm:$0xff]  ;;  %v235_v8 = vunpack.c.h.bf16 %v1544_v42 }
  0x5f   :  { %v1556_v7 = vld [vmem:[#allocation3 + $0x168] sm:$0xff]  ;;  %v1558_v33 = vld [vmem:[#allocation3 + $0x170] sm:$0xff]  ;;  %v1564_v4 = vld [vmem:[#allocation3 + $0x178] sm:$0xff] }
  0x60   :  { %1050 = vmatpush3.bf16.msra.mxu0 %v1141_v14  ;;  %v1478_v14 = vld [vmem:[#allocation3 + $0xc0] sm:$0xff]  ;;  %2009 = vst [vmem:[#allocation33_spill] sm:$0xff] %v1558_v33  ;;  %2010 = vst [vmem:[#allocation34_spill] sm:$0xff] %v1564_v4  ;;  %v1568_v54 = vld [vmem:[#allocation3 + $0x188] sm:$0xff] }
  0x61   :  { %1051 = vmatprep.subr.bf16.mxu0 %v1142_v36  ;;  %2001 = vst [vmem:[#allocation25_spill] sm:$0xff] %v1478_v14  ;;  %v1480_v36 = vld [vmem:[#allocation3 + $0xc8] sm:$0xff]  ;;  %v1566_v39 = vld [vmem:[#allocation3 + $0x180] sm:$0xff]  ;;  %2012 = vst [vmem:[#allocation36_spill] sm:$0xff] %v1568_v54  ;;  %v251_v44 = vunpack.c.h.bf16 %v1568_v54 }
  0x62   :  { %2002 = vst [vmem:[#allocation26_spill] sm:$0xff] %v1480_v36  ;;  %2011 = vst [vmem:[#allocation35_spill] sm:$0xff] %v1566_v39  ;;  %v1576_v52 = vld [vmem:[#allocation3 + $0x198] sm:$0xff]  ;;  %v1582_v48 = vld [vmem:[#allocation3 + $0x1a0] sm:$0xff]  ;;  %v249_v42 = vunpack.c.h.bf16 %v1566_v39  ;;  %v2034_v39 = vunpack.c.h.bf16 %v1480_v36 }
  0x63   :  { %2014 = vst [vmem:[#allocation38_spill] sm:$0xff] %v1576_v52  ;;  %2015 = vst [vmem:[#allocation39_spill] sm:$0xff] %v1582_v48  ;;  %v1584_v40 = vld [vmem:[#allocation3 + $0x1a8] sm:$0xff]  ;;  %v1590_v21 = vld [vmem:[#allocation3 + $0x1b0] sm:$0xff]  ;;  %v255_v4 = vunpack.c.h.bf16 %v1576_v52  ;;  %v257_v54 = vunpack.c.h.bf16 %v1582_v48 }
  0x64   :  { %1052 = vmatpush3.bf16.msra.mxu0 %v1143_v55  ;;  %v1512_v55 = vld [vmem:[#allocation3 + $0x108] sm:$0xff]  ;;  %2016 = vst [vmem:[#allocation40_spill] sm:$0xff] %v1584_v40  ;;  %2017 = vst [vmem:[#allocation41_spill] sm:$0xff] %v1590_v21  ;;  %v1592_v26 = vld [vmem:[#allocation3 + $0x1b8] sm:$0xff]  ;;  %v259_v59 = vunpack.c.h.bf16 %v1584_v40 }
  0x65   :  { %1053 = vmatprep.subr.bf16.mxu0 %v1144_v62  ;;  %2005 = vst [vmem:[#allocation29_spill] sm:$0xff] %v1512_v55  ;;  %v1574_v62 = vld [vmem:[#allocation3 + $0x190] sm:$0xff]  ;;  %2018 = vst [vmem:[#allocation42_spill] sm:$0xff] %v1592_v26  ;;  %v1598_v45 = vld [vmem:[#allocation3 + $0x1c0] sm:$0xff] }
  0x66   :  { %2013 = vst [vmem:[#allocation37_spill] sm:$0xff] %v1574_v62  ;;  %2019 = vst [vmem:[#allocation43_spill] sm:$0xff] %v1598_v45  ;;  %v1600_v20 = vld [vmem:[#allocation3 + $0x1c8] sm:$0xff]  ;;  %v1606_v6 = vld [vmem:[#allocation3 + $0x1d0] sm:$0xff]  ;;  %v253_v47 = vunpack.c.h.bf16 %v1574_v62  ;;  %v265_v5 = vunpack.c.h.bf16 %v1598_v45 }
  0x67   :  { %2020 = vst [vmem:[#allocation44_spill] sm:$0xff] %v1600_v20  ;;  %2021 = vst [vmem:[#allocation45_spill] sm:$0xff] %v1606_v6  ;;  %v1608_v10 = vld [vmem:[#allocation3 + $0x1d8] sm:$0xff]  ;;  %v1614_v23 = vld [vmem:[#allocation3 + $0x1e0] sm:$0xff]  ;;  %v267_v48 = vunpack.c.h.bf16 %v1600_v20  ;;  %v269_v40 = vunpack.c.h.bf16 %v1606_v6 }
  0x68   :  { %1054 = vmatpush3.bf16.msra.mxu0 %v1145_v60  ;;  %v1546_v60 = vld [vmem:[#allocation3 + $0x150] sm:$0xff]  ;;  %2022 = vst [vmem:[#allocation46_spill] sm:$0xff] %v1608_v10  ;;  %2023 = vst [vmem:[#allocation47_spill] sm:$0xff] %v1614_v23  ;;  %v1616_v3 = vld [vmem:[#allocation3 + $0x1e8] sm:$0xff]  ;;  %v271_v62 = vunpack.c.h.bf16 %v1608_v10  ;;  %v273_v52 = vunpack.c.h.bf16 %v1614_v23  ;;  %v2028_v10 = vunpack.c.h.bf16 %v1396_v12  ;;  %v2030_v23 = vunpack.c.h.bf16 %v1420_v29 }
  0x69   :  { %2024 = vst [vmem:[#allocation48_spill] sm:$0xff] %v1616_v3  ;;  %v1622_v33 = vld [vmem:[#allocation3 + $0x1f0] sm:$0xff]  ;;  %v1624_v19 = vld [vmem:[#allocation3 + $0x1f8] sm:$0xff]  ;;  %v275_v45 = vunpack.c.h.bf16 %v1616_v3  ;;  %v2031_v3 = vunpack.c.h.bf16 %v1446_v49  ;;  %v2036_v12 = vunpack.c.h.bf16 %v1512_v55  ;;  %v449_v29 = vadd.f32 %v251_v44, %v249_v42 }
  0x6a   :  { %2025 = vst [vmem:[#allocation49_spill] sm:$0xff] %v1622_v33  ;;  %2026 = vst [vmem:[#allocation50_spill] sm:$0xff] %v1624_v19  ;;  %v277_v20 = vunpack.c.h.bf16 %v1622_v33  ;;  %v279_v6 = vunpack.c.h.bf16 %v1624_v19  ;;  %v293_v26 = vadd.f32 %v2028_v10, %v2027_v41  ;;  %v319_v32 = vadd.f32 %v2030_v23, %v2029_v46 }
  0x6b   :  { %v345_v21 = vadd.f32 %v2032_v53, %v2031_v3  ;;  %v2033_v33 = vunpack.c.h.bf16 %v1478_v14  ;;  %v397_v41 = vadd.f32 %v2036_v12, %v2035_v11  ;;  %v2037_v10 = vunpack.c.h.bf16 %v1538_v2 }
  0x6c   :  { %v475_v23 = vadd.f32 %v267_v48, %v265_v5  ;;  %v2038_v46 = vunpack.c.h.bf16 %v1398_v13  ;;  %v2039_v53 = vunpack.c.h.bf16 %v1422_v30  ;;  %v2040_v14 = vunpack.c.h.bf16 %v1454_v56 }
  0x6d   :  { %v371_v19 = vadd.f32 %v2034_v39, %v2033_v33  ;;  %v423_v24 = vadd.f32 %v235_v8, %v2037_v10  ;;  %v2041_v33 = vunpack.c.h.bf16 %v1486_v34  ;;  %v2042_v55 = vunpack.c.h.bf16 %v1518_v27 }
  0x6e   :  { %v294_v49 = vadd.f32 %v293_v26, %v2038_v46  ;;  %v320_v3 = vadd.f32 %v319_v32, %v2039_v53  ;;  %v346_v36 = vadd.f32 %v345_v21, %v2040_v14  ;;  %v2043_v12 = vunpack.c.h.bf16 %v1546_v60 }
  0x6f   :  { %v372_v39 = vadd.f32 %v371_v19, %v2041_v33  ;;  %v398_v11 = vadd.f32 %v397_v41, %v2042_v55  ;;  %v450_v42 = vadd.f32 %v449_v29, %v253_v47  ;;  %v476_v44 = vadd.f32 %v475_v23, %v269_v40 }
  0x70   :  { %v424_v8 = vadd.f32 %v423_v24, %v2043_v12  ;;  %v2044_v48 = vunpack.c.h.bf16 %v1400_v15  ;;  %v2045_v5 = vunpack.c.h.bf16 %v1424_v31  ;;  %v2046_v10 = vunpack.c.h.bf16 %v1456_v57 }
  0x71   :  { %v2047_v14 = vunpack.c.h.bf16 %v1488_v58  ;;  %v2048_v46 = vunpack.c.h.bf16 %v1520_v25  ;;  %v2049_v41 = vunpack.c.h.bf16 %v1548_v35  ;;  %v451_v29 = vadd.f32 %v450_v42, %v255_v4 }
  0x72   :  { %v295_v26 = vadd.f32 %v294_v49, %v2044_v48  ;;  %v321_v32 = vadd.f32 %v320_v3, %v2045_v5  ;;  %v347_v21 = vadd.f32 %v346_v36, %v2046_v10  ;;  %v477_v40 = vadd.f32 %v476_v44, %v271_v62 }
  0x73   :  { %v373_v19 = vadd.f32 %v372_v39, %v2047_v14  ;;  %v399_v55 = vadd.f32 %v398_v11, %v2048_v46  ;;  %v425_v24 = vadd.f32 %v424_v8, %v2049_v41  ;;  %v2050_v47 = vunpack.c.h.bf16 %v1402_v16 }
  0x74   :  { %v2051_v23 = vunpack.c.h.bf16 %v1430_v37  ;;  %v2052_v3 = vunpack.c.h.bf16 %v1462_v63  ;;  %v2053_v33 = vunpack.c.h.bf16 %v1494_v51  ;;  %v2054_v12 = vunpack.c.h.bf16 %v1526_v9 }
  0x75   :  { %v296_v49 = vadd.f32 %v295_v26, %v2050_v47  ;;  %v2055_v48 = vunpack.c.h.bf16 %v1554_v28  ;;  %v452_v4 = vadd.f32 %v451_v29, %v257_v54  ;;  %v478_v62 = vadd.f32 %v477_v40, %v273_v52 }
  0x76   :  { %v322_v53 = vadd.f32 %v321_v32, %v2051_v23  ;;  %v348_v36 = vadd.f32 %v347_v21, %v2052_v3  ;;  %v374_v39 = vadd.f32 %v373_v19, %v2053_v33  ;;  %v400_v11 = vadd.f32 %v399_v55, %v2054_v12  ;;  %v2066_v3 = vld [vmem:[#allocation27_spill] sm:$0xff] }
  0x77   :  { %v426_v8 = vadd.f32 %v425_v24, %v2055_v48  ;;  %v2056_v42 = vunpack.c.h.bf16 %v1404_v17  ;;  %v2057_v26 = vunpack.c.h.bf16 %v1432_v38  ;;  %v2058_v32 = vunpack.c.h.bf16 %v1464_v0  ;;  %v2070_v48 = vld [vmem:[#allocation33_spill] sm:$0xff] }
  0x78   :  { %v2059_v21 = vunpack.c.h.bf16 %v1496_v1  ;;  %v2060_v19 = vunpack.c.h.bf16 %v1528_v61  ;;  %v2061_v55 = vunpack.c.h.bf16 %v1556_v7  ;;  %v453_v54 = vadd.f32 %v452_v4, %v259_v59  ;;  %v2072_v59 = vld [vmem:[#allocation41_spill] sm:$0xff] }
  0x79   :  { %v297_v44 = vadd.f32 %v296_v49, %v2056_v42  ;;  %v323_v5 = vadd.f32 %v322_v53, %v2057_v26  ;;  %v349_v10 = vadd.f32 %v348_v36, %v2058_v32  ;;  %v479_v52 = vadd.f32 %v478_v62, %v275_v45  ;;  %v2064_v49 = vld [vmem:[#allocation23_spill] sm:$0xff] }
  0x7a   :  { %v375_v14 = vadd.f32 %v374_v39, %v2059_v21  ;;  %v401_v46 = vadd.f32 %v400_v11, %v2060_v19  ;;  %v427_v41 = vadd.f32 %v426_v8, %v2061_v55  ;;  %v2062_v24 = vunpack.c.h.bf16 %v1410_v22  ;;  %v2068_v39 = vld [vmem:[#allocation30_spill] sm:$0xff] }
  0x7b   :  { %v2063_v40 = vunpack.c.h.bf16 %v1438_v43  ;;  %v2065_v23 = vunpack.c.h.bf16 %v2064_v49  ;;  %v2067_v36 = vunpack.c.h.bf16 %v2066_v3  ;;  %v2069_v12 = vunpack.c.h.bf16 %v2068_v39 }
  0x7c   :  { %v298_v29 = vadd.f32 %v297_v44, %v2062_v24  ;;  %v2071_v42 = vunpack.c.h.bf16 %v2070_v48  ;;  %v2073_v45 = vunpack.c.h.bf16 %v2072_v59  ;;  %v480_v62 = vadd.f32 %v479_v52, %v277_v20  ;;  %v2074_v44 = vld [vmem:[#allocation18_spill] sm:$0xff] }
  0x7d   :  { %v324_v47 = vadd.f32 %v323_v5, %v2063_v40  ;;  %v350_v53 = vadd.f32 %v349_v10, %v2065_v23  ;;  %v376_v33 = vadd.f32 %v375_v14, %v2067_v36  ;;  %v402_v11 = vadd.f32 %v401_v46, %v2069_v12  ;;  %v2076_v5 = vld [vmem:[#allocation21_spill] sm:$0xff]  ;;  %v2078_v10 = vld [vmem:[#allocation24_spill] sm:$0xff]  ;;  %v2082_v46 = vld [vmem:[#allocation31_spill] sm:$0xff] }
  0x7e   :  { %v428_v8 = vadd.f32 %v427_v41, %v2071_v42  ;;  %v454_v4 = vadd.f32 %v453_v54, %v2073_v45  ;;  %v2075_v26 = vunpack.c.h.bf16 %v2074_v44  ;;  %v2077_v21 = vunpack.c.h.bf16 %v2076_v5  ;;  %v2080_v14 = vld [vmem:[#allocation28_spill] sm:$0xff]  ;;  %v2084_v41 = vld [vmem:[#allocation34_spill] sm:$0xff] }
  0x7f   :  { %v2079_v55 = vunpack.c.h.bf16 %v2078_v10  ;;  %v2081_v40 = vunpack.c.h.bf16 %v2080_v14  ;;  %v2083_v36 = vunpack.c.h.bf16 %v2082_v46  ;;  %v2085_v42 = vunpack.c.h.bf16 %v2084_v41  ;;  %v2086_v54 = vld [vmem:[#allocation42_spill] sm:$0xff] }
  0x80   :  { %v299_v32 = vadd.f32 %v298_v29, %v2075_v26  ;;  %v325_v19 = vadd.f32 %v324_v47, %v2077_v21  ;;  %v2087_v20 = vunpack.c.h.bf16 %v2086_v54  ;;  %v481_v45 = vadd.f32 %v480_v62, %v279_v6 }
  0x81   :  { %v351_v24 = vadd.f32 %v350_v53, %v2079_v55  ;;  %v377_v23 = vadd.f32 %v376_v33, %v2081_v40  ;;  %v403_v12 = vadd.f32 %v402_v11, %v2083_v36  ;;  %v429_v59 = vadd.f32 %v428_v8, %v2085_v42 }
  0x82   :  { %v455_v52 = vadd.f32 %v454_v4, %v2087_v20  ;;  %v300_v29 = vrot.slane %v299_v32, 4  ;;  %v326_v26 = vrot.slane %v325_v19, 4  ;;  %v482_v55 = vrot.slane %v481_v45, 4 }
  0x83   :  { %v352_v5 = vrot.slane %v351_v24, 4  ;;  %v378_v47 = vrot.slane %v377_v23, 4  ;;  %v404_v21 = vrot.slane %v403_v12, 4  ;;  %v430_v10 = vrot.slane %v429_v59, 4 }
  0x84   :  { %v456_v53 = vrot.slane %v455_v52, 4  ;;  %v301_v33 = vadd.f32 %v300_v29, %v299_v32  ;;  %v327_v40 = vadd.f32 %v326_v26, %v325_v19  ;;  %v483_v54 = vadd.f32 %v482_v55, %v481_v45 }
  0x85   :  { %v353_v46 = vadd.f32 %v352_v5, %v351_v24  ;;  %v379_v11 = vadd.f32 %v378_v47, %v377_v23  ;;  %v405_v36 = vadd.f32 %v404_v21, %v403_v12  ;;  %v431_v8 = vadd.f32 %v430_v10, %v429_v59 }
  0x86   :  { %v457_v42 = vadd.f32 %v456_v53, %v455_v52  ;;  %v302_v6 = vrot.slane %v301_v33, 2  ;;  %v328_v4 = vrot.slane %v327_v40, 2  ;;  %v484_v48 = vrot.slane %v483_v54, 2 }
  0x87   :  { %v354_v62 = vrot.slane %v353_v46, 2  ;;  %v380_v20 = vrot.slane %v379_v11, 2  ;;  %v406_v41 = vrot.slane %v405_v36, 2  ;;  %v432_v14 = vrot.slane %v431_v8, 2 }
  0x88   :  { %v458_v44 = vrot.slane %v457_v42, 2  ;;  %v303_v32 = vadd.f32 %v302_v6, %v301_v33  ;;  %v329_v19 = vadd.f32 %v328_v4, %v327_v40  ;;  %v485_v12 = vadd.f32 %v484_v48, %v483_v54  ;;  %v2088_v48 = vld [vmem:[#allocation16_spill] sm:$0xff]  ;;  %v2090_v54 = vld [vmem:[#allocation17_spill] sm:$0xff] }
  0x89   :  { %v355_v5 = vadd.f32 %v354_v62, %v353_v46  ;;  %v381_v24 = vadd.f32 %v380_v20, %v379_v11  ;;  %v407_v23 = vadd.f32 %v406_v41, %v405_v36  ;;  %v433_v59 = vadd.f32 %v432_v14, %v431_v8  ;;  %v2094_v62 = vld [vmem:[#allocation20_spill] sm:$0xff] }
  0x8a   :  { %v459_v10 = vadd.f32 %v458_v44, %v457_v42  ;;  %v304_v52 = vrot.slane %v303_v32, 1  ;;  %v330_v45 = vrot.slane %v329_v19, 1  ;;  %v486_v55 = vrot.slane %v485_v12, 1  ;;  %v2092_v42 = vld [vmem:[#allocation19_spill] sm:$0xff] }
  0x8b   :  { %v356_v29 = vrot.slane %v355_v5, 1  ;;  %v382_v26 = vrot.slane %v381_v24, 1  ;;  %v408_v47 = vrot.slane %v407_v23, 1  ;;  %v434_v21 = vrot.slane %v433_v59, 1 }
  0x8c   :  { %v460_v53 = vrot.slane %v459_v10, 1  ;;  %v305_v39 = vadd.f32 %v304_v52, %v303_v32  ;;  %v331_v3 = vadd.f32 %v330_v45, %v329_v19  ;;  %v487_v41 = vadd.f32 %v486_v55, %v485_v12  ;;  %v2096_v32 = vld [vmem:[#allocation22_spill] sm:$0xff]  ;;  %v2104_v45 = vld [vmem:[#allocation29_spill] sm:$0xff] }
  0x8d   :  { %v357_v33 = vadd.f32 %v356_v29, %v355_v5  ;;  %v383_v40 = vadd.f32 %v382_v26, %v381_v24  ;;  %v409_v46 = vadd.f32 %v408_v47, %v407_v23  ;;  %v435_v11 = vadd.f32 %v434_v21, %v433_v59  ;;  %v2099_v59 = vld [vmem:[#allocation25_spill] sm:$0xff]  ;;  %v2107_v21 = vld [vmem:[#allocation32_spill] sm:$0xff] }
  0x8e   :  { %v461_v6 = vadd.f32 %v460_v53, %v459_v10  ;;  %v518_v44 = vsel %vm504_vm0, %v331_v3, %v305_v39  ;;  %v2089_v14 = vunpack.c.l.bf16 %v2088_v48  ;;  %v2091_v36 = vunpack.c.l.bf16 %v2090_v54  ;;  %v2101_v3 = vld [vmem:[#allocation26_spill] sm:$0xff] }
  0x8f   :  { %v2093_v4 = vunpack.c.l.bf16 %v2092_v42  ;;  %v2095_v20 = vunpack.c.l.bf16 %v2094_v62  ;;  %v2097_v19 = vunpack.c.l.bf16 %v2096_v32  ;;  %v2098_v5 = vunpack.c.l.bf16 %v1448_v50 }
  0x90   :  { %v280_v8 = vadd.f32 %v2091_v36, %v2089_v14  ;;  %v519_v23 = vsel %vm506_vm1, %v357_v33, %v518_v44  ;;  %v2100_v10 = vunpack.c.l.bf16 %v2099_v59  ;;  %v2102_v39 = vunpack.c.l.bf16 %v2101_v3 }
  0x91   :  { %v306_v49 = vadd.f32 %v2095_v20, %v2093_v4  ;;  %v332_v24 = vadd.f32 %v2098_v5, %v2097_v19  ;;  %v2103_v52 = vunpack.c.l.bf16 %v1510_v18  ;;  %v2105_v29 = vunpack.c.l.bf16 %v2104_v45 }
  0x92   :  { %v358_v12 = vadd.f32 %v2102_v39, %v2100_v10  ;;  %v2106_v47 = vunpack.c.l.bf16 %v1538_v2  ;;  %v2108_v53 = vunpack.c.l.bf16 %v2107_v21  ;;  %v520_v50 = vsel %vm508_vm2, %v383_v40, %v519_v23  ;;  %v2132_v21 = vld [vmem:[#allocation36_spill] sm:$0xff] }
  0x93   :  { %v384_v26 = vadd.f32 %v2105_v29, %v2103_v52  ;;  %v2109_v48 = vunpack.c.l.bf16 %v1398_v13  ;;  %v2110_v44 = vunpack.c.l.bf16 %v1422_v30  ;;  %v2111_v54 = vunpack.c.l.bf16 %v1454_v56 }
  0x94   :  { %v410_v55 = vadd.f32 %v2108_v53, %v2106_v47  ;;  %v521_v18 = vsel %vm510_vm3, %v409_v46, %v520_v50  ;;  %v2112_v42 = vunpack.c.l.bf16 %v1486_v34  ;;  %v2113_v2 = vunpack.c.l.bf16 %v1518_v27 }
  0x95   :  { %v281_v33 = vadd.f32 %v280_v8, %v2109_v48  ;;  %v307_v14 = vadd.f32 %v306_v49, %v2110_v44  ;;  %v333_v36 = vadd.f32 %v332_v24, %v2111_v54  ;;  %v2114_v20 = vunpack.c.l.bf16 %v1546_v60  ;;  %v2139_v44 = vld [vmem:[#allocation44_spill] sm:$0xff] }
  0x96   :  { %v359_v4 = vadd.f32 %v358_v12, %v2112_v42  ;;  %v385_v62 = vadd.f32 %v384_v26, %v2113_v2  ;;  %v522_v13 = vsel %vm512_vm4, %v435_v11, %v521_v18  ;;  %v2115_v8 = vunpack.c.l.bf16 %v1400_v15  ;;  %v2130_v26 = vld [vmem:[#allocation35_spill] sm:$0xff] }
  0x97   :  { %v411_v40 = vadd.f32 %v410_v55, %v2114_v20  ;;  %v2116_v49 = vunpack.c.l.bf16 %v1424_v31  ;;  %v2117_v32 = vunpack.c.l.bf16 %v1456_v57  ;;  %v523_v34 = vsel %vm514_vm5, %v461_v6, %v522_v13 }
  0x98   :  { %v282_v30 = vadd.f32 %v281_v33, %v2115_v8  ;;  %v2118_v19 = vunpack.c.l.bf16 %v1488_v58  ;;  %v2119_v5 = vunpack.c.l.bf16 %v1520_v25  ;;  %v2120_v24 = vunpack.c.l.bf16 %v1548_v35  ;;  %v2149_v8 = vld [vmem:[#allocation30_spill] sm:$0xff] }
  0x99   :  { %v308_v56 = vadd.f32 %v307_v14, %v2116_v49  ;;  %v334_v46 = vadd.f32 %v333_v36, %v2117_v32  ;;  %v524_v15 = vsel %vm516_vm6, %v487_v41, %v523_v34  ;;  %v2121_v23 = vunpack.c.l.bf16 %v1402_v16 }
  0x9a   :  { %v360_v27 = vadd.f32 %v359_v4, %v2118_v19  ;;  %v386_v60 = vadd.f32 %v385_v62, %v2119_v5  ;;  %v412_v11 = vadd.f32 %v411_v40, %v2120_v24  ;;  %v2122_v59 = vunpack.c.l.bf16 %v1430_v37  ;;  %v2143_v4 = vld [vmem:[#allocation23_spill] sm:$0xff]  ;;  %v2145_v62 = vld [vmem:[#allocation37_spill] sm:$0xff] }
  0x9b   :  { %v283_v31 = vadd.f32 %v282_v30, %v2121_v23  ;;  %v2123_v10 = vunpack.c.l.bf16 %v1462_v63  ;;  %v538_v3 = vpack.c.bf16 %v524_v15, %v524_v15  ;;  %v2124_v58 = vunpack.c.l.bf16 %v1494_v51  ;;  %v2147_v40 = vld [vmem:[#allocation27_spill] sm:$0xff]  ;;  %v2159_v15 = vld [vmem:[#allocation24_spill] sm:$0xff] }
  0x9c   :  { %v309_v57 = vadd.f32 %v308_v56, %v2122_v59  ;;  %v2125_v25 = vunpack.c.l.bf16 %v1526_v9  ;;  %v2126_v35 = vunpack.c.l.bf16 %v1554_v28  ;;  %v2127_v41 = vunpack.c.l.bf16 %v1404_v17  ;;  %v2151_v56 = vld [vmem:[#allocation33_spill] sm:$0xff]  ;;  %v2161_v59 = vld [vmem:[#allocation38_spill] sm:$0xff] }
  0x9d   :  { %v335_v6 = vadd.f32 %v334_v46, %v2123_v10  ;;  %v361_v39 = vadd.f32 %v360_v27, %v2124_v58  ;;  %v2128_v45 = vunpack.c.l.bf16 %v1432_v38  ;;  %v2129_v29 = vunpack.c.l.bf16 %v1464_v0  ;;  %699 = vmatprep.mubr.bf16.mxu0 %v538_v3  ;;  %v2137_v38 = vld [vmem:[#allocation43_spill] sm:$0xff] }
  0x9e   :  { %v387_v12 = vadd.f32 %v386_v60, %v2125_v25  ;;  %v413_v52 = vadd.f32 %v412_v11, %v2126_v35  ;;  %v284_v16 = vadd.f32 %v283_v31, %v2127_v41  ;;  %v2131_v47 = vunpack.c.l.bf16 %v2130_v26  ;;  %v2157_v60 = vld [vmem:[#allocation21_spill] sm:$0xff]  ;;  %v2167_v35 = vld [vmem:[#allocation34_spill] sm:$0xff] }
  0x9f   :  { %v310_v37 = vadd.f32 %v309_v57, %v2128_v45  ;;  %v336_v63 = vadd.f32 %v335_v6, %v2129_v29  ;;  %v2133_v51 = vunpack.c.l.bf16 %v2132_v21  ;;  %v2134_v9 = vunpack.c.l.bf16 %v1496_v1  ;;  %v2163_v6 = vld [vmem:[#allocation28_spill] sm:$0xff] }
  0xa0   :  { %v2135_v28 = vunpack.c.l.bf16 %v1528_v61  ;;  %v2136_v17 = vunpack.c.l.bf16 %v1556_v7  ;;  %v2138_v33 = vunpack.c.l.bf16 %v2137_v38  ;;  %v2140_v0 = vunpack.c.l.bf16 %v2139_v44  ;;  %v2175_v44 = vld [vmem:[#allocation40_spill] sm:$0xff] }
  0xa1   :  { %v436_v53 = vadd.f32 %v2133_v51, %v2131_v47  ;;  %v362_v55 = vadd.f32 %v361_v39, %v2134_v9  ;;  %v2141_v54 = vunpack.c.l.bf16 %v1410_v22  ;;  %v2142_v18 = vunpack.c.l.bf16 %v1438_v43  ;;  %v2153_v22 = vld [vmem:[#allocation45_spill] sm:$0xff]  ;;  %v2155_v43 = vld [vmem:[#allocation18_spill] sm:$0xff]  ;;  %v2165_v39 = vld [vmem:[#allocation31_spill] sm:$0xff] }
  0xa2   :  { %v388_v50 = vadd.f32 %v387_v12, %v2135_v28  ;;  %v414_v48 = vadd.f32 %v413_v52, %v2136_v17  ;;  %v462_v14 = vadd.f32 %v2140_v0, %v2138_v33  ;;  %v2144_v1 = vunpack.c.l.bf16 %v2143_v4  ;;  %v2171_v47 = vld [vmem:[#allocation39_spill] sm:$0xff] }
  0xa3   :  { %v285_v36 = vadd.f32 %v284_v16, %v2141_v54  ;;  %v311_v42 = vadd.f32 %v310_v37, %v2142_v18  ;;  %v2146_v61 = vunpack.c.l.bf16 %v2145_v62  ;;  %v2148_v7 = vunpack.c.l.bf16 %v2147_v40  ;;  %v2169_v16 = vld [vmem:[#allocation46_spill] sm:$0xff]  ;;  %v2173_v28 = vld [vmem:[#allocation47_spill] sm:$0xff] }
  0xa4   :  { %v337_v2 = vadd.f32 %v336_v63, %v2144_v1  ;;  %v2150_v30 = vunpack.c.l.bf16 %v2149_v8  ;;  %v2152_v32 = vunpack.c.l.bf16 %v2151_v56  ;;  %v2154_v34 = vunpack.c.l.bf16 %v2153_v22 }
  0xa5   :  { %v437_v20 = vadd.f32 %v436_v53, %v2146_v61  ;;  %v363_v13 = vadd.f32 %v362_v55, %v2148_v7  ;;  %v2156_v27 = vunpack.c.l.bf16 %v2155_v43  ;;  %v2158_v24 = vunpack.c.l.bf16 %v2157_v60 }
  0xa6   :  { %v389_v49 = vadd.f32 %v388_v50, %v2150_v30  ;;  %v415_v46 = vadd.f32 %v414_v48, %v2152_v32  ;;  %v463_v19 = vadd.f32 %v462_v14, %v2154_v34  ;;  %v2160_v23 = vunpack.c.l.bf16 %v2159_v15 }
  0xa7   :  { %v286_v5 = vadd.f32 %v285_v36, %v2156_v27  ;;  %v312_v11 = vadd.f32 %v311_v42, %v2158_v24  ;;  %v2162_v57 = vunpack.c.l.bf16 %v2161_v59  ;;  %v2164_v3 = vunpack.c.l.bf16 %v2163_v6  ;;  %v2177_v42 = vld [vmem:[#allocation48_spill] sm:$0xff] }
  0xa8   :  { %v338_v31 = vadd.f32 %v337_v2, %v2160_v23  ;;  %v2166_v25 = vunpack.c.l.bf16 %v2165_v39  ;;  %v2168_v52 = vunpack.c.l.bf16 %v2167_v35  ;;  %v2170_v45 = vunpack.c.l.bf16 %v2169_v16 }
  0xa9   :  { %v438_v10 = vadd.f32 %v437_v20, %v2162_v57  ;;  %v364_v58 = vadd.f32 %v363_v13, %v2164_v3  ;;  %v287_v29 = vrot.slane %v286_v5, 4  ;;  %v313_v63 = vrot.slane %v312_v11, 4  ;;  %v2179_v20 = vld [vmem:[#allocation41_spill] sm:$0xff] }
  0xaa   :  { %v390_v12 = vadd.f32 %v389_v49, %v2166_v25  ;;  %v416_v41 = vadd.f32 %v415_v46, %v2168_v52  ;;  %v464_v37 = vadd.f32 %v463_v19, %v2170_v45  ;;  %v339_v26 = vrot.slane %v338_v31, 4  ;;  %v2181_v49 = vld [vmem:[#allocation49_spill] sm:$0xff]  ;;  %v2183_v19 = vld [vmem:[#allocation42_spill] sm:$0xff] }
  0xab   :  { %v2172_v21 = vunpack.c.l.bf16 %v2171_v47  ;;  %v365_v53 = vrot.slane %v364_v58, 4  ;;  %v2174_v50 = vunpack.c.l.bf16 %v2173_v28  ;;  %v288_v48 = vadd.f32 %v287_v29, %v286_v5 }
  0xac   :  { %v391_v9 = vrot.slane %v390_v12, 4  ;;  %v417_v55 = vrot.slane %v416_v41, 4  ;;  %v314_v38 = vadd.f32 %v313_v63, %v312_v11  ;;  %v340_v33 = vadd.f32 %v339_v26, %v338_v31  ;;  %v2185_v11 = vld [vmem:[#allocation50_spill] sm:$0xff] }
  0xad   :  { %v439_v51 = vadd.f32 %v438_v10, %v2172_v21  ;;  %v465_v17 = vadd.f32 %v464_v37, %v2174_v50  ;;  %v2176_v0 = vunpack.c.l.bf16 %v2175_v44  ;;  %v366_v54 = vadd.f32 %v365_v53, %v364_v58 }
  0xae   :  { %v392_v36 = vadd.f32 %v391_v9, %v390_v12  ;;  %v418_v18 = vadd.f32 %v417_v55, %v416_v41  ;;  %v2178_v4 = vunpack.c.l.bf16 %v2177_v42  ;;  %v289_v2 = vrot.slane %v288_v48, 2  ;;  %v1150_v42 = vld [vmem:[#allocation8 + $0x20] sm:$0xff]  }
  0xaf   :  { %v440_v14 = vadd.f32 %v439_v51, %v2176_v0  ;;  %v315_v62 = vrot.slane %v314_v38, 2  ;;  %v341_v61 = vrot.slane %v340_v33, 2  ;;  %v2180_v40 = vunpack.c.l.bf16 %v2179_v20  ;;  %v1146_v0 = vld [vmem:[#allocation8] sm:$0xff]  }
  0xb0   :  { %v466_v1 = vadd.f32 %v465_v17, %v2178_v4  ;;  %v367_v13 = vrot.slane %v366_v54, 2  ;;  %v393_v8 = vrot.slane %v392_v36, 2  ;;  %v419_v30 = vrot.slane %v418_v18, 2  ;;  %v1151_v4 = vld [vmem:[#allocation8 + $0x28] sm:$0xff]  }
  0xb1   :  { %v441_v7 = vadd.f32 %v440_v14, %v2180_v40  ;;  %v2182_v56 = vunpack.c.l.bf16 %v2181_v49  ;;  %v290_v46 = vadd.f32 %v289_v2, %v288_v48  ;;  %v316_v22 = vadd.f32 %v315_v62, %v314_v38  ;;  %v1153_v2 = vld [vmem:[#allocation8 + $0x38] sm:$0xff]  }
  0xb2   :  { %v342_v34 = vadd.f32 %v341_v61, %v340_v33  ;;  %v2184_v43 = vunpack.c.l.bf16 %v2183_v19  ;;  %v368_v5 = vadd.f32 %v367_v13, %v366_v54  ;;  %v394_v60 = vadd.f32 %v393_v8, %v392_v36  ;;  %v1147_v54 = vld [vmem:[#allocation8 + $0x8] sm:$0xff]   ;;  %v1148_v36 = vld [vmem:[#allocation8 + $0x10] sm:$0xff]  }
  0xb3   :  { %v467_v32 = vadd.f32 %v466_v1, %v2182_v56  ;;  %v420_v24 = vadd.f32 %v419_v30, %v418_v18  ;;  %v2186_v15 = vunpack.c.l.bf16 %v2185_v11  ;;  %v291_v31 = vrot.slane %v290_v46, 1  ;;  %v1149_v18 = vld [vmem:[#allocation8 + $0x18] sm:$0xff]   ;;  %v1152_v1 = vld [vmem:[#allocation8 + $0x30] sm:$0xff]  }
  0xb4   :  { %v442_v27 = vadd.f32 %v441_v7, %v2184_v43  ;;  %v317_v59 = vrot.slane %v316_v22, 1  ;;  %v343_v57 = vrot.slane %v342_v34, 1  ;;  %v369_v6 = vrot.slane %v368_v5, 1 }
  0xb5   :  { %v468_v23 = vadd.f32 %v467_v32, %v2186_v15  ;;  %v395_v3 = vrot.slane %v394_v60, 1  ;;  %v421_v58 = vrot.slane %v420_v24, 1  ;;  %v292_v25 = vadd.f32 %v291_v31, %v290_v46 }
  0xb6   :  { %v443_v10 = vrot.slane %v442_v27, 4  ;;  %v318_v12 = vadd.f32 %v317_v59, %v316_v22  ;;  %v344_v35 = vadd.f32 %v343_v57, %v342_v34  ;;  %v370_v41 = vadd.f32 %v369_v6, %v368_v5 }
  0xb7   :  { %v469_v39 = vrot.slane %v468_v23, 4  ;;  %v396_v16 = vadd.f32 %v395_v3, %v394_v60  ;;  %v422_v63 = vadd.f32 %v421_v58, %v420_v24  ;;  %v1292_v14 = vmov 0.0  }
  0xb8   :  { %v444_v52 = vadd.f32 %v443_v10, %v442_v27  ;;  %v505_v29 = vsel %vm504_vm0, %v318_v12, %v292_v25  ;;  %1079 = vmatprep.subr.bf16.mxu1 %v1292_v14  ;;  %1099 = vmatprep.subr.bf16.mxu0 %v1292_v14  ;;  %v1907_v10 = vld [vmem:[%s1942_s4] sm:$0xf] }
  0xb9   :  { %v470_v45 = vadd.f32 %v469_v39, %v468_v23  ;;  %v507_v47 = vsel %vm506_vm1, %v344_v35, %v505_v29  ;;  %1080 = vmatpush3.bf16.msra.mxu1 %v1146_v0  ;;  %1095 = vmatprep.mubr.msk.bf16.mxu1 %vm1293_vm7, %v1292_v14  ;;  %v728_v23 = vlaneseq  ;;  %v1156_v29 = vld [vmem:[#allocation9 + $0x10] sm:$0xff]  }
  0xba   :  { %v445_v37 = vrot.slane %v444_v52, 2  ;;  %v509_v51 = vsel %vm508_vm2, %v370_v41, %v507_v47  ;;  %1081 = vmatprep.subr.bf16.mxu1 %v1292_v14  ;;  %v1159_v47 = vld [vmem:[#allocation9 + $0x28] sm:$0xff]  }
  0xbb   :  { %v471_v26 = vrot.slane %v470_v45, 2  ;;  %v511_v9 = vsel %vm510_vm3, %v396_v16, %v509_v51  ;;  %v1901_v59 = vshrl.u32 %v728_v23, 7  ;;  %v1161_v51 = vld [vmem:[#allocation9 + $0x38] sm:$0xff]  }
  0xbc   :  { %v446_v21 = vadd.f32 %v445_v37, %v444_v52  ;;  %v513_v50 = vsel %vm512_vm4, %v422_v63, %v511_v9  ;;  %v1155_v37 = vld [vmem:[#allocation9 + $0x8] sm:$0xff]   ;;  %v1157_v63 = vld [vmem:[#allocation9 + $0x18] sm:$0xff]  }
  0xbd   :  { %v472_v53 = vadd.f32 %v471_v26, %v470_v45  ;;  %1082 = vmatpush3.bf16.msra.mxu1 %v1147_v54  ;;  %v730_v57 = vsub.s32 0, %v1901_v59  ;;  %v735_v6 = vsub.s32 1, %v1901_v59  ;;  %v1154_v45 = vld [vmem:[#allocation9] sm:$0xff]  }
  0xbe   :  { %v447_v55 = vrot.slane %v446_v21, 1  ;;  %1083 = vmatprep.subr.bf16.mxu1 %v1292_v14  ;;  %v1158_v26 = vld [vmem:[#allocation9 + $0x20] sm:$0xff]  }
  0xbf   :  { %v473_v28 = vrot.slane %v472_v53, 1  ;;  %v731_v58 = vrot.slane %v1907_v10, %v730_v57  ;;  %v736_v12 = vrot.slane %v1907_v10, %v735_v6 }
  0xc0   :  { %v448_v17 = vadd.f32 %v447_v55, %v446_v21  ;;  %v1160_v21 = vld [vmem:[#allocation9 + $0x30] sm:$0xff]  }
  0xc1   :  { %v474_v48 = vadd.f32 %v473_v28, %v472_v53  ;;  %1084 = vmatpush3.bf16.msra.mxu1 %v1148_v36 }
  0xc2   :  { %v515_v38 = vsel %vm514_vm5, %v448_v17, %v513_v50  ;;  %1085 = vmatprep.subr.bf16.mxu1 %v1292_v14 }
  0xc3   :  { %v517_v33 = vsel %vm516_vm6, %v474_v48, %v515_v38 }
  0xc4   :  { %v537_v44 = vpack.c.bf16 %v517_v33, %v517_v33 }
  0xc5   :  { %1086 = vmatpush3.bf16.msra.mxu1 %v1149_v18 }
  0xc6   :  { %700 = vmatmul.mubr.bf16.vlgmr.msra.gmra.mrb[0].mxu0 %v537_v44  ;;  %1087 = vmatprep.subr.bf16.mxu1 %v1292_v14 }
  0xc7   :  { %1115 = vmatprep.mubr.msk.bf16.mxu0 %vm1293_vm7, %v1292_v14  ;;  %1100 = vmatpush3.bf16.msra.mxu0 %v1154_v45 }
  0xc8   :  { %1101 = vmatprep.subr.bf16.mxu0 %v1292_v14 }
  0xc9   :  { %1088 = vmatpush3.bf16.msra.mxu1 %v1150_v42 }
  0xca   :  { %1089 = vmatprep.subr.bf16.mxu1 %v1292_v14 }
  0xcb   :  { %1102 = vmatpush3.bf16.msra.mxu0 %v1155_v37 }
  0xcc   :  { %1103 = vmatprep.subr.bf16.mxu0 %v1292_v14 }
  0xcd   :  { %1090 = vmatpush3.bf16.msra.mxu1 %v1151_v4 }
  0xce   :  { %1091 = vmatprep.subr.bf16.mxu1 %v1292_v14 }
  0xcf   :  { %1104 = vmatpush3.bf16.msra.mxu0 %v1156_v29 }
  0xd0   :  { %1105 = vmatprep.subr.bf16.mxu0 %v1292_v14 }
  0xd1   :  { %1092 = vmatpush3.bf16.msra.mxu1 %v1152_v1 }
  0xd2   :  { %1093 = vmatprep.subr.bf16.mxu1 %v1292_v14 }
  0xd3   :  { %1106 = vmatpush3.bf16.msra.mxu0 %v1157_v63 }
  0xd4   :  { %1107 = vmatprep.subr.bf16.mxu0 %v1292_v14 }
  0xd5   :  { %1094 = vmatpush3.bf16.msra.mxu1 %v1153_v2 }
  0xd7   :  { %1108 = vmatpush3.bf16.msra.mxu0 %v1158_v26 }
  0xd8   :  { %1109 = vmatprep.subr.bf16.mxu0 %v1292_v14 }
  0xdb   :  { %1110 = vmatpush3.bf16.msra.mxu0 %v1159_v47 }
  0xdc   :  { %1111 = vmatprep.subr.bf16.mxu0 %v1292_v14 }
  0xdf   :  { %1112 = vmatpush3.bf16.msra.mxu0 %v1160_v21 }
  0xe0   :  { %1113 = vmatprep.subr.bf16.mxu0 %v1292_v14 }
  0xe3   :  { %1114 = vmatpush3.bf16.msra.mxu0 %v1161_v51 }
 0x199   :  { %v1055_v62 = vpop.f32.mrb[0].mxu0 }
 0x19a   :  { %v1056_v61 = vpop.f32.mrb[1].mxu0 }
 0x19b   :  { %v1057_v20 = vadd.f32 %v1056_v61, %v1055_v62  ;;  %v1058_v40 = vpop.f32.mrb[2].mxu0 }
 0x19c   :  { %v1059_v7 = vpop.f32.mrb[3].mxu0  ;;  %v867_v40 = vsub.s32 2, %v1901_v59 }
 0x19d   :  { %v707_v13 = vrot.slane %v1057_v20, 4  ;;  %v714_v8 = vmul.f32 %v1057_v20, %v1057_v20  ;;  %v872_v7 = vsub.s32 3, %v1901_v59 }
 0x19f   :  { %v708_v30 = vadd.f32 %v1057_v20, %v707_v13  ;;  %v715_v49 = vrot.slane %v714_v8, 4 }
 0x1a1   :  { %v709_v56 = vrot.slane %v708_v30, 2  ;;  %v716_v32 = vadd.f32 %v715_v49, %v714_v8  ;;  %v868_v8 = vrot.slane %v1907_v10, %v867_v40 }
 0x1a3   :  { %v710_v46 = vadd.f32 %v709_v56, %v708_v30  ;;  %v717_v22 = vrot.slane %v716_v32, 2  ;;  %v873_v56 = vrot.slane %v1907_v10, %v872_v7 }
 0x1a5   :  { %v711_v34 = vrot.slane %v710_v46, 1  ;;  %v718_v19 = vadd.f32 %v717_v22, %v716_v32 }
 0x1a7   :  { %v712_v43 = vadd.f32 %v711_v34, %v710_v46  ;;  %v719_v27 = vrot.slane %v718_v19, 1 }
 0x1a9   :  { %v713_v5 = vmul.f32 0.125, %v712_v43  ;;  %v720_v60 = vadd.f32 %v719_v27, %v718_v19  ;;  %v1030_v19 = vld [vmem:[%s1943_s5] ss:$0 sm:$0xff] }
 0x1ab   :  { %v721_v24 = vmul.f32 0.125, %v720_v60  ;;  %v722_v11 = vmul.f32 %v713_v5, %v713_v5  ;;  %v724_v3 = vsub.f32 %v1057_v20, %v713_v5 }
 0x1ad   :  { %v723_v15 = vsub.f32 %v721_v24, %v722_v11 }
 0x1af   :  { %v725_v31 = vadd.f32 1e-05, %v723_v15 }
 0x1b1   :  { %1162 = vrsqrt.f32 %v725_v31 }
 0x1bb   :  { %v1163_v39 = vpop.eup %1162 }
 0x1bc   :  { %v727_v25 = vmul.f32 %v1163_v39, %v724_v3 }
 0x1be   :  { %v732_v35 = vmul.f32 %v731_v58, %v727_v25 }
 0x1c0   :  { %v737_v52 = vadd.f32 %v736_v12, %v732_v35 }
 0x1c2   :  { %v738_v41 = vmax.f32 %v737_v52, 0.0 }
 0x1c4   :  { %v739_v16 = vpack.c.bf16 %v738_v41, %v738_v41 }
 0x1c6   :  { %1096 = vmatmul.mubr.bf16.vlgmr.msra.gmra.mrb[0].mxu1 %v739_v16 }
 0x299   :  { %v838_v53 = vpop.f32.mrb[0].mxu1 }
 0x29a   :  { %v844_v9 = vrot.slane %v838_v53, 4  ;;  %v851_v55 = vmul.f32 %v838_v53, %v838_v53  ;;  %v1097_v28 = vpop.f32.mrb[1].mxu1 }
 0x29b   :  { %v841_v50 = vpop.f32.mrb[2].mxu1 }
 0x29c   :  { %v845_v17 = vadd.f32 %v844_v9, %v838_v53  ;;  %v852_v48 = vrot.slane %v851_v55, 4  ;;  %v1098_v38 = vpop.f32.mrb[3].mxu1 }
 0x29e   :  { %v846_v33 = vrot.slane %v845_v17, 2  ;;  %v853_v44 = vadd.f32 %v852_v48, %v851_v55 }
 0x2a0   :  { %v847_v0 = vadd.f32 %v846_v33, %v845_v17  ;;  %v854_v54 = vrot.slane %v853_v44, 2 }
 0x2a2   :  { %v848_v36 = vrot.slane %v847_v0, 1  ;;  %v855_v18 = vadd.f32 %v854_v54, %v853_v44 }
 0x2a4   :  { %v849_v42 = vadd.f32 %v848_v36, %v847_v0  ;;  %v856_v4 = vrot.slane %v855_v18, 1 }
 0x2a6   :  { %v850_v1 = vmul.f32 0.125, %v849_v42  ;;  %v857_v2 = vadd.f32 %v856_v4, %v855_v18 }
 0x2a8   :  { %v858_v14 = vmul.f32 0.125, %v857_v2  ;;  %v859_v62 = vmul.f32 %v850_v1, %v850_v1  ;;  %v861_v13 = vsub.f32 %v838_v53, %v850_v1 }
 0x2aa   :  { %v860_v61 = vsub.f32 %v858_v14, %v859_v62 }
 0x2ac   :  { %v862_v20 = vadd.f32 1e-05, %v860_v61 }
 0x2ae   :  { %1164 = vrsqrt.f32 %v862_v20 }
 0x2b8   :  { %v1165_v30 = vpop.eup %1164 }
 0x2b9   :  { %v864_v49 = vmul.f32 %v1165_v30, %v861_v13 }
 0x2bb   :  { %v869_v32 = vmul.f32 %v868_v8, %v864_v49 }
 0x2bd   :  { %v874_v46 = vadd.f32 %v873_v56, %v869_v32 }
 0x2bf   :  { %v875_v22 = vmax.f32 %v874_v46, 0.0 }
 0x2c1   :  { %v876_v34 = vpack.c.bf16 %v875_v22, %v875_v22 }
 0x2c3   :  { %1116 = vmatmul.mubr.bf16.vlgmr.msra.gmra.mrb[4].mxu0 %v876_v34 }
 0x396   :  { %v982_v43 = vpop.f32.mrb[4].mxu0 }
 0x397   :  { %v983_v27 = vadd.f32 %v1030_v19, %v982_v43  ;;  %v1117_v5 = vpop.f32.mrb[5].mxu0 }
 0x398   :  { %v985_v60 = vpop.f32.mrb[6].mxu0 }
 0x399   :  { %988 = vst [vmem:[#allocation11] sm:$0xff] %v983_v27  ;;  %v1118_v24 = vpop.f32.mrb[7].mxu0 }
 0x39a   :  { %1265 = shalt.err (!%p1262_p8)
}
 0x39b   :  { %s1266_s5 = scalar_lea.hbm %s1944_s6, 128 }
 0x39c   :  { %p1267_p9 = scmp.ne.s32.totalorder %s1944_s6, %s1266_s5  ;;  %p1270_p10 = scmp.lt.u32.totalorder %s1266_s5, %s1944_s6 }
 0x39e   :  { %p1272_p11 = pnand %p1270_p10, %p1267_p9 }
 0x3a0   :  { %1275 = shalt.err (!%p1272_p11)
}
 0x3a1   :  { %998 = dma.vmem_to_hbm [thread:$0]  %s996_s24, 128, %s1944_s6, [#allocation5]  }
 0x3a2   :  { %1282 = dma.done.wait [#allocation5], 128  }
 0x3a3   :  { %1283 = vsyncadd [#allocation5], 4294967168 }
 0x3a4   :  { %1002 = vsyncpa [#allocation4], 1 }
 0x3a5   :  { %1003 = vsyncpa [#allocation7], 1 }
 0x3a6   :  { %1004 = vsyncpa [#allocation10], 1 }
 0x3a7   :  { %1005 = vsyncpa [#allocation5], 1 }

</bundles_post_ra>
